<compile_context>
chip_gen: v7x
topology: tpu7x:2x2x1
jax: 0.10.0
libtpu: 0.0.40
codegen_flags: <defaults>
</compile_context>

<pallas_src>
import jax
import jax.numpy as jnp
from jax.experimental import pallas as pl
from jax.experimental.pallas import tpu as pltpu


def _round_up(x, m):
    return ((x + m - 1) // m) * m


def mlp_kernel(x_ref, w1_ref, b1_ref, w2_ref, b2_ref,
               w3_ref, b3_ref, w4_ref, b4_ref, o_ref):
    # One batch tile per grid step; weights/biases are VMEM-resident (constant
    # index_map). bf16 inputs -> f32 accumulation on the MXU; elementwise in f32.
    h = jnp.dot(x_ref[...], w1_ref[...],
                preferred_element_type=jnp.float32) + b1_ref[...]
    h = jnp.maximum(h, 0.0)
    h = jnp.dot(h.astype(jnp.bfloat16), w2_ref[...],
                preferred_element_type=jnp.float32) + b2_ref[...]
    h = jnp.maximum(h, 0.0)
    h = jnp.dot(h.astype(jnp.bfloat16), w3_ref[...],
                preferred_element_type=jnp.float32) + b3_ref[...]
    h = jnp.maximum(h, 0.0)
    h = jnp.dot(h.astype(jnp.bfloat16), w4_ref[...],
                preferred_element_type=jnp.float32) + b4_ref[...]
    o_ref[...] = h.astype(o_ref.dtype)


def prepare_params(params, *, lane=128):
    """One-time parameter prep (do NOT call per forward):
    transpose PyTorch [out, in] -> [in, out], cast weights to bf16, and zero-pad
    hid3 / out_size up to a multiple of 128 so the last two matmuls and the
    output store are lane-dense. Biases stay f32 (added post-accumulation)."""
    (w1, b1), (w2, b2), (w3, b3), (w4, b4) = (
        params["linear1"], params["linear2"], params["linear3"], params["linear4"]
    )
    hid3 = w3.shape[0]
    out_size = w4.shape[0]
    hid3_p = _round_up(hid3, lane)
    out_p = _round_up(out_size, lane)

    w1t = jnp.asarray(w1.T, jnp.bfloat16)                                   # [in, h1]
    w2t = jnp.asarray(w2.T, jnp.bfloat16)                                   # [h1, h2]
    w3t = jnp.pad(w3.T, ((0, 0), (0, hid3_p - hid3))).astype(jnp.bfloat16)  # [h2, 128]
    w4t = jnp.pad(w4.T, ((0, hid3_p - hid3),
                         (0, out_p - out_size))).astype(jnp.bfloat16)       # [128, 128]

    b1p = jnp.asarray(b1, jnp.float32).reshape(1, -1)
    b2p = jnp.asarray(b2, jnp.float32).reshape(1, -1)
    b3p = jnp.pad(jnp.asarray(b3, jnp.float32), (0, hid3_p - hid3)).reshape(1, -1)
    b4p = jnp.pad(jnp.asarray(b4, jnp.float32), (0, out_p - out_size)).reshape(1, -1)

    return {"w1": w1t, "b1": b1p, "w2": w2t, "b2": b2p,
            "w3": w3t, "b3": b3p, "w4": w4t, "b4": b4p,
            "out_size": out_size}


def cifar10_model_forward(x, prepped, *, tile_m=256):
    """x: [B, C, H, W] float32. prepped: output of prepare_params()."""
    B = x.shape[0]
    x_flat = x.reshape(B, -1).astype(jnp.bfloat16)  # == xb.view(xb.size(0), -1)
    in_size = x_flat.shape[1]
    out_size = prepped["out_size"]

    w1, b1 = prepped["w1"], prepped["b1"]
    w2, b2 = prepped["w2"], prepped["b2"]
    w3, b3 = prepped["w3"], prepped["b3"]
    w4, b4 = prepped["w4"], prepped["b4"]
    n_pad = w4.shape[1]  # lane-padded logits width (128)

    # Pad batch to a bf16-sublane-friendly multiple and pick the batch tile.
    b16 = _round_up(max(B, 1), 16)
    tm = min(tile_m, b16)
    b_pad = _round_up(b16, tm)
    if b_pad != B:
        x_flat = jnp.pad(x_flat, ((0, b_pad - B), (0, 0)))
    grid = (b_pad // tm,)

    def const2d(i):       # weights/biases: same block for every batch tile
        return (0, 0)

    def batch_map(i):     # x / out: walk the batch tiles
        return (i, 0)

    in_specs = [
        pl.BlockSpec((tm, in_size), batch_map),
        pl.BlockSpec(w1.shape, const2d), pl.BlockSpec(b1.shape, const2d),
        pl.BlockSpec(w2.shape, const2d), pl.BlockSpec(b2.shape, const2d),
        pl.BlockSpec(w3.shape, const2d), pl.BlockSpec(b3.shape, const2d),
        pl.BlockSpec(w4.shape, const2d), pl.BlockSpec(b4.shape, const2d),
    ]
    out_spec = pl.BlockSpec((tm, n_pad), batch_map)

    weight_args = (w1, b1, w2, b2, w3, b3, w4, b4)
    flops = 2 * b_pad * (w1.shape[0] * w1.shape[1] + w2.shape[0] * w2.shape[1]
                         + w3.shape[0] * w3.shape[1] + w4.shape[0] * w4.shape[1])
    bytes_accessed = (x_flat.size * x_flat.dtype.itemsize
                      + sum(a.size * a.dtype.itemsize for a in weight_args)
                      + b_pad * n_pad * 4)

    out_padded = pl.pallas_call(
        mlp_kernel,
        out_shape=jax.ShapeDtypeStruct((b_pad, n_pad), jnp.float32),
        grid=grid,
        in_specs=in_specs,
        out_specs=out_spec,
        compiler_params=pltpu.CompilerParams(
            dimension_semantics=("parallel",)),
        cost_estimate=pl.CostEstimate(flops=flops, transcendentals=0,
                                      bytes_accessed=bytes_accessed),
    )(x_flat, *weight_args)

    return out_padded[:B, :out_size]


def init_linear(key, in_features, out_features):
    # Deterministic init mimicking nn.Linear default: U(-1/sqrt(in), 1/sqrt(in)).
    kw, kb = jax.random.split(key)
    bound = 1.0 / (in_features ** 0.5)
    w = jax.random.uniform(kw, (out_features, in_features), jnp.float32, -bound, bound)
    b = jax.random.uniform(kb, (out_features,), jnp.float32, -bound, bound)
    return w, b


def reference_forward_f32(x, params):
    # Pure-JAX f32 reference with the original PyTorch-layout params.
    h = x.reshape(x.shape[0], -1)
    for name in ("linear1", "linear2", "linear3"):
        w, b = params[name]
        h = jnp.maximum(h @ w.T + b, 0.0)
    w, b = params["linear4"]
    return h @ w.T + b


def reference_forward_matched(x, prepped):
    # Pure-JAX reference mimicking the kernel's bf16-input / f32-accum math.
    h = x.reshape(x.shape[0], -1).astype(jnp.bfloat16)
    for wn, bn in (("w1", "b1"), ("w2", "b2"), ("w3", "b3")):
        h32 = jnp.dot(h, prepped[wn], preferred_element_type=jnp.float32) + prepped[bn]
        h = jnp.maximum(h32, 0.0).astype(jnp.bfloat16)
    out = jnp.dot(h, prepped["w4"], preferred_element_type=jnp.float32) + prepped["b4"]
    return out[:, :prepped["out_size"]]


if __name__ == "__main__":
    # Small shapes consistent with the forward: batch=2, channels=4, spatial=16
    # -> in_size = 4*16*16 = 1024; hidden sizes 256/128/64; 10 classes.
    B, C, H, W = 2, 4, 16, 16
    in_size, hid1, hid2, hid3, out_size = C * H * W, 256, 128, 64, 10

    key = jax.random.PRNGKey(0)
    kx, k1, k2, k3, k4 = jax.random.split(key, 5)

    x = jax.random.normal(kx, (B, C, H, W), jnp.float32)
    params = {
        "linear1": init_linear(k1, in_size, hid1),
        "linear2": init_linear(k2, hid1, hid2),
        "linear3": init_linear(k3, hid2, hid3),
        "linear4": init_linear(k4, hid3, out_size),
    }

    prepped = prepare_params(params)          # one-time prep (transpose + bf16 + pad)
    out = cifar10_model_forward(x, prepped)
    out = jax.block_until_ready(out)

    assert out.shape == (B, out_size), out.shape

    # Tight check vs a reference using identical bf16/f32 numerics.
    ref_matched = reference_forward_matched(x, prepped)
    assert jnp.allclose(out, ref_matched, atol=2e-3, rtol=2e-3), "mismatch vs bf16-matched reference"

    # Loose sanity check vs the pure-f32 PyTorch-semantics reference
    # (bf16 weights => ~1% relative error expected).
    ref_f32 = reference_forward_f32(x, params)
    assert jnp.allclose(out, ref_f32, atol=5e-2, rtol=5e-2), "mismatch vs f32 reference"

    print("KERNEL_OK")
</pallas_src>

<mosaic_0001>
module attributes {stable_mosaic.version = 11 : i64} {
  func.func @mlp_kernel(%arg0: i32, %arg1: memref<16x1024xbf16, #tpu.memory_space<vmem>>, %arg2: memref<1024x256xbf16, #tpu.memory_space<vmem>>, %arg3: memref<1x256xf32, #tpu.memory_space<vmem>>, %arg4: memref<256x128xbf16, #tpu.memory_space<vmem>>, %arg5: memref<1x128xf32, #tpu.memory_space<vmem>>, %arg6: memref<128x128xbf16, #tpu.memory_space<vmem>>, %arg7: memref<1x128xf32, #tpu.memory_space<vmem>>, %arg8: memref<128x128xbf16, #tpu.memory_space<vmem>>, %arg9: memref<1x128xf32, #tpu.memory_space<vmem>>, %arg10: memref<16x128xf32, #tpu.memory_space<vmem>>) attributes {dimension_semantics = [#tpu.dimension_semantics<parallel>], iteration_bounds = array<i64: 1>, scalar_prefetch = 0 : i64, scratch_operands = 0 : i64, tpu.core_type = #tpu.core_type<tc>, window_params = [{transform_indices = @transform_0, window_bounds = array<i64: 16, 1024>}, {pipeline_mode = #tpu.pipeline_mode<synchronous>, transform_indices = @transform_1, window_bounds = array<i64: 1024, 256>}, {pipeline_mode = #tpu.pipeline_mode<synchronous>, transform_indices = @transform_2, window_bounds = array<i64: 1, 256>}, {pipeline_mode = #tpu.pipeline_mode<synchronous>, transform_indices = @transform_3, window_bounds = array<i64: 256, 128>}, {pipeline_mode = #tpu.pipeline_mode<synchronous>, transform_indices = @transform_4, window_bounds = array<i64: 1, 128>}, {pipeline_mode = #tpu.pipeline_mode<synchronous>, transform_indices = @transform_5, window_bounds = array<i64: 128, 128>}, {pipeline_mode = #tpu.pipeline_mode<synchronous>, transform_indices = @transform_6, window_bounds = array<i64: 1, 128>}, {pipeline_mode = #tpu.pipeline_mode<synchronous>, transform_indices = @transform_7, window_bounds = array<i64: 128, 128>}, {pipeline_mode = #tpu.pipeline_mode<synchronous>, transform_indices = @transform_8, window_bounds = array<i64: 1, 128>}, {transform_indices = @transform_9, window_bounds = array<i64: 16, 128>}]} {
    %c0 = arith.constant 0 : index
    %c0_0 = arith.constant 0 : index
    %0 = vector.load %arg1[%c0, %c0_0] : memref<16x1024xbf16, #tpu.memory_space<vmem>>, vector<16x1024xbf16>
    %c0_1 = arith.constant 0 : index
    %c0_2 = arith.constant 0 : index
    %1 = vector.load %arg2[%c0_1, %c0_2] : memref<1024x256xbf16, #tpu.memory_space<vmem>>, vector<1024x256xbf16>
    %cst = arith.constant dense<0.000000e+00> : vector<16x256xf32>
    %2 = tpu.matmul %0, %1, %cst {dimension_numbers = #tpu.dot_dimension_numbers<[1], [0], [0], [1], [0, 0, 1, 1], [], []>} : vector<16x1024xbf16>, vector<1024x256xbf16>, vector<16x256xf32> -> vector<16x256xf32>
    %c0_3 = arith.constant 0 : index
    %c0_4 = arith.constant 0 : index
    %3 = vector.load %arg3[%c0_3, %c0_4] : memref<1x256xf32, #tpu.memory_space<vmem>>, vector<1x256xf32>
    %4 = vector.broadcast %3 : vector<1x256xf32> to vector<16x256xf32>
    %5 = arith.addf %2, %4 : vector<16x256xf32>
    %cst_5 = arith.constant 0.000000e+00 : f32
    %6 = vector.broadcast %cst_5 : f32 to vector<16x256xf32>
    %7 = arith.maximumf %5, %6 : vector<16x256xf32>
    %8 = arith.truncf %7 : vector<16x256xf32> to vector<16x256xbf16>
    %c0_6 = arith.constant 0 : index
    %c0_7 = arith.constant 0 : index
    %9 = vector.load %arg4[%c0_6, %c0_7] : memref<256x128xbf16, #tpu.memory_space<vmem>>, vector<256x128xbf16>
    %cst_8 = arith.constant dense<0.000000e+00> : vector<16x128xf32>
    %10 = tpu.matmul %8, %9, %cst_8 {dimension_numbers = #tpu.dot_dimension_numbers<[1], [0], [0], [1], [0, 0, 1, 1], [], []>} : vector<16x256xbf16>, vector<256x128xbf16>, vector<16x128xf32> -> vector<16x128xf32>
    %c0_9 = arith.constant 0 : index
    %c0_10 = arith.constant 0 : index
    %11 = vector.load %arg5[%c0_9, %c0_10] : memref<1x128xf32, #tpu.memory_space<vmem>>, vector<1x128xf32>
    %12 = vector.broadcast %11 : vector<1x128xf32> to vector<16x128xf32>
    %13 = arith.addf %10, %12 : vector<16x128xf32>
    %cst_11 = arith.constant 0.000000e+00 : f32
    %14 = vector.broadcast %cst_11 : f32 to vector<16x128xf32>
    %15 = arith.maximumf %13, %14 : vector<16x128xf32>
    %16 = arith.truncf %15 : vector<16x128xf32> to vector<16x128xbf16>
    %c0_12 = arith.constant 0 : index
    %c0_13 = arith.constant 0 : index
    %17 = vector.load %arg6[%c0_12, %c0_13] : memref<128x128xbf16, #tpu.memory_space<vmem>>, vector<128x128xbf16>
    %cst_14 = arith.constant dense<0.000000e+00> : vector<16x128xf32>
    %18 = tpu.matmul %16, %17, %cst_14 {dimension_numbers = #tpu.dot_dimension_numbers<[1], [0], [0], [1], [0, 0, 1, 1], [], []>} : vector<16x128xbf16>, vector<128x128xbf16>, vector<16x128xf32> -> vector<16x128xf32>
    %c0_15 = arith.constant 0 : index
    %c0_16 = arith.constant 0 : index
    %19 = vector.load %arg7[%c0_15, %c0_16] : memref<1x128xf32, #tpu.memory_space<vmem>>, vector<1x128xf32>
    %20 = vector.broadcast %19 : vector<1x128xf32> to vector<16x128xf32>
    %21 = arith.addf %18, %20 : vector<16x128xf32>
    %cst_17 = arith.constant 0.000000e+00 : f32
    %22 = vector.broadcast %cst_17 : f32 to vector<16x128xf32>
    %23 = arith.maximumf %21, %22 : vector<16x128xf32>
    %24 = arith.truncf %23 : vector<16x128xf32> to vector<16x128xbf16>
    %c0_18 = arith.constant 0 : index
    %c0_19 = arith.constant 0 : index
    %25 = vector.load %arg8[%c0_18, %c0_19] : memref<128x128xbf16, #tpu.memory_space<vmem>>, vector<128x128xbf16>
    %cst_20 = arith.constant dense<0.000000e+00> : vector<16x128xf32>
    %26 = tpu.matmul %24, %25, %cst_20 {dimension_numbers = #tpu.dot_dimension_numbers<[1], [0], [0], [1], [0, 0, 1, 1], [], []>} : vector<16x128xbf16>, vector<128x128xbf16>, vector<16x128xf32> -> vector<16x128xf32>
    %c0_21 = arith.constant 0 : index
    %c0_22 = arith.constant 0 : index
    %27 = vector.load %arg9[%c0_21, %c0_22] : memref<1x128xf32, #tpu.memory_space<vmem>>, vector<1x128xf32>
    %28 = vector.broadcast %27 : vector<1x128xf32> to vector<16x128xf32>
    %29 = arith.addf %26, %28 : vector<16x128xf32>
    %c0_23 = arith.constant 0 : index
    %c0_24 = arith.constant 0 : index
    %30 = vector.load %arg10[%c0_23, %c0_24] : memref<16x128xf32, #tpu.memory_space<vmem>>, vector<16x128xf32>
    tpu.vector_store %arg10[%c0_23, %c0_24], %29 {strides = array<i32>} : memref<16x128xf32, #tpu.memory_space<vmem>>, vector<16x128xf32>,
    return
  }
  func.func @transform_0(%arg0: i32) -> (i32, i32) {
    %c0_i32 = arith.constant 0 : i32
    %c0_i32_0 = arith.constant 0 : i32
    return %arg0, %c0_i32 : i32, i32
  }
  func.func @transform_1(%arg0: i32) -> (i32, i32) {
    %c0_i32 = arith.constant 0 : i32
    %c0_i32_0 = arith.constant 0 : i32
    %c0_i32_1 = arith.constant 0 : i32
    return %c0_i32, %c0_i32_0 : i32, i32
  }
  func.func @transform_2(%arg0: i32) -> (i32, i32) {
    %c0_i32 = arith.constant 0 : i32
    %c0_i32_0 = arith.constant 0 : i32
    %c0_i32_1 = arith.constant 0 : i32
    return %c0_i32, %c0_i32_0 : i32, i32
  }
  func.func @transform_3(%arg0: i32) -> (i32, i32) {
    %c0_i32 = arith.constant 0 : i32
    %c0_i32_0 = arith.constant 0 : i32
    %c0_i32_1 = arith.constant 0 : i32
    return %c0_i32, %c0_i32_0 : i32, i32
  }
  func.func @transform_4(%arg0: i32) -> (i32, i32) {
    %c0_i32 = arith.constant 0 : i32
    %c0_i32_0 = arith.constant 0 : i32
    %c0_i32_1 = arith.constant 0 : i32
    return %c0_i32, %c0_i32_0 : i32, i32
  }
  func.func @transform_5(%arg0: i32) -> (i32, i32) {
    %c0_i32 = arith.constant 0 : i32
    %c0_i32_0 = arith.constant 0 : i32
    %c0_i32_1 = arith.constant 0 : i32
    return %c0_i32, %c0_i32_0 : i32, i32
  }
  func.func @transform_6(%arg0: i32) -> (i32, i32) {
    %c0_i32 = arith.constant 0 : i32
    %c0_i32_0 = arith.constant 0 : i32
    %c0_i32_1 = arith.constant 0 : i32
    return %c0_i32, %c0_i32_0 : i32, i32
  }
  func.func @transform_7(%arg0: i32) -> (i32, i32) {
    %c0_i32 = arith.constant 0 : i32
    %c0_i32_0 = arith.constant 0 : i32
    %c0_i32_1 = arith.constant 0 : i32
    return %c0_i32, %c0_i32_0 : i32, i32
  }
  func.func @transform_8(%arg0: i32) -> (i32, i32) {
    %c0_i32 = arith.constant 0 : i32
    %c0_i32_0 = arith.constant 0 : i32
    %c0_i32_1 = arith.constant 0 : i32
    return %c0_i32, %c0_i32_0 : i32, i32
  }
  func.func @transform_9(%arg0: i32) -> (i32, i32) {
    %c0_i32 = arith.constant 0 : i32
    %c0_i32_0 = arith.constant 0 : i32
    return %arg0, %c0_i32 : i32, i32
  }
}

</mosaic_0001>

<bundles_post_ra>
// kernel: tpu_custom_call.1
= control target key start
LH: loop header
LB: loop body
LE: loop exit
PB: predicated region body
PF: predicated region fallthrough
CT: control target
= control target key end

     0   :  { %14 = vsyncpa [#allocation3], 0  ;;  %s2387_s0 = inlined_call_operand.hbm [shape: bf16[16,1024], index: 0, kind: input, shape index: {}]   ;;  %s2388_s1 = inlined_call_operand.hbm [shape: bf16[1024,256], index: 1, kind: input, shape index: {}]   ;;  %s2389_s2 = inlined_call_operand.vmem [shape: f32[1,256], index: 2, kind: input, shape index: {}]   ;;  %s2390_s3 = inlined_call_operand.hbm [shape: bf16[256,128], index: 3, kind: input, shape index: {}]   ;;  %s2391_s4 = inlined_call_operand.vmem [shape: f32[1,128], index: 4, kind: input, shape index: {}]   ;;  %s2392_s5 = inlined_call_operand.hbm [shape: bf16[128,128], index: 5, kind: input, shape index: {}]   ;;  %s2393_s6 = inlined_call_operand.vmem [shape: f32[1,128], index: 6, kind: input, shape index: {}]   ;;  %s2394_s7 = inlined_call_operand.hbm [shape: bf16[128,128], index: 7, kind: input, shape index: {}]   ;;  %s2395_s8 = inlined_call_operand.vmem [shape: f32[1,128], index: 8, kind: input, shape index: {}]   ;;  %s2396_s9 = inlined_call_operand.hbm [shape: f32[16,128], index: 9, kind: output, shape index: {}]  }
   0x1   :  { %15 = vsyncpa [#allocation6], 0 }
   0x2   :  { %16 = vsyncpa [#allocation9], 0 }
   0x3   :  { %17 = vsyncpa [#allocation4], 0  ;;  %s2180_s30 = smov [#allocation5]   ;;  %s2040_s13 = scalar_lea.hbm %s2388_s1, 16384 }
   0x4   :  { %s35_s10 = sshll.u32 %s2180_s30, 4  ;;  %p2041_p0 = scmp.ne.s32.totalorder %s2388_s1, %s2040_s13  ;;  %s36_s10 = int_to_ptr.vmem [resolvable:$true] %s35_s10 }
   0x5   :  { %p2044_p1 = scmp.lt.u32.totalorder %s2040_s13, %s2388_s1 }
   0x7   :  { %p2046_p2 = pnand %p2044_p1, %p2041_p0 }
   0x9   :  { %2049 = shalt.err (!%p2046_p2)
}
   0xa   :  { %s2050_s18 = scalar_lea.vmem %s36_s10, 16384  ;;  %p2055_p4 = scmp.lt.s32.totalorder %s36_s10, %s36_s10 }
   0xb   :  { %p2051_p3 = scmp.ne.s32.totalorder %s36_s10, %s2050_s18  ;;  %p2056_p5 = scmp.lt.s32.totalorder %s2050_s18, %s2050_s18 }
   0xd   :  { %p2057_p6 = por %p2056_p5, %p2055_p4 }
   0xf   :  { %p2058_p7 = pnand %p2057_p6, %p2051_p3 }
  0x11   :  { %2061 = shalt.err (!%p2058_p7)
}
  0x12   :  { %s2181_s19 = smov 128   ;;  %s2182_s20 = smov 8  }
  0x13   :  { %41 = dma.hbm_to_vmem [thread:$0]  %s2388_s1, 16384, %s36_s10, [#allocation6], %s2181_s19, %s2181_s19, %s2182_s20  }
  0x14   :  { %s2183_s23 = smov [#allocation8]   ;;  %s2184_s25 = smov [#allocation2]  }
  0x15   :  { %s63_s24 = sshll.u32 %s2183_s23, 4  ;;  %s23_s26 = sshll.u32 %s2184_s25, 4  ;;  %s64_s24 = int_to_ptr.vmem [resolvable:$true] %s63_s24  ;;  %s24_s26 = int_to_ptr.vmem [resolvable:$true] %s23_s26 }
  0x16   :  { %s2062_s29 = scalar_lea.hbm %s2392_s5, 1024 }
  0x17   :  { %p2063_p8 = scmp.ne.s32.totalorder %s2392_s5, %s2062_s29  ;;  %p2066_p9 = scmp.lt.u32.totalorder %s2062_s29, %s2392_s5 }
  0x19   :  { %p2068_p10 = pnand %p2066_p9, %p2063_p8 }
  0x1b   :  { %2071 = shalt.err (!%p2068_p10)
}
  0x1c   :  { %s2072_s1 = scalar_lea.vmem %s64_s24, 1024  ;;  %p2077_p12 = scmp.lt.s32.totalorder %s64_s24, %s64_s24 }
  0x1d   :  { %p2073_p11 = scmp.ne.s32.totalorder %s64_s24, %s2072_s1  ;;  %p2078_p13 = scmp.lt.s32.totalorder %s2072_s1, %s2072_s1 }
  0x1f   :  { %p2079_p0 = por %p2078_p13, %p2077_p12 }
  0x21   :  { %p2080_p1 = pnand %p2079_p0, %p2073_p11 }
  0x23   :  { %2083 = shalt.err (!%p2080_p1)
}
  0x24   :  { %s2185_s10 = smov 64   ;;  %s2186_s14 = smov 4  }
  0x25   :  { %69 = dma.hbm_to_vmem [thread:$0]  %s2392_s5, 1024, %s64_s24, [#allocation9], %s2185_s10, %s2185_s10, %s2186_s14  }
  0x26   :  { %s2084_s21 = scalar_lea.hbm %s2387_s0, 1024 }
  0x27   :  { %p2085_p2 = scmp.ne.s32.totalorder %s2387_s0, %s2084_s21  ;;  %p2088_p3 = scmp.lt.u32.totalorder %s2084_s21, %s2387_s0 }
  0x29   :  { %p2090_p4 = pnand %p2088_p3, %p2085_p2 }
  0x2b   :  { %2093 = shalt.err (!%p2090_p4)
}
  0x2c   :  { %s2094_s28 = scalar_lea.vmem %s24_s26, 1024  ;;  %p2099_p6 = scmp.lt.s32.totalorder %s24_s26, %s24_s26 }
  0x2d   :  { %p2095_p5 = scmp.ne.s32.totalorder %s24_s26, %s2094_s28  ;;  %p2100_p7 = scmp.lt.s32.totalorder %s2094_s28, %s2094_s28 }
  0x2f   :  { %p2101_p8 = por %p2100_p7, %p2099_p6 }
  0x31   :  { %p2102_p9 = pnand %p2101_p8, %p2095_p5 }
  0x33   :  { %2105 = shalt.err (!%p2102_p9)
}
  0x34   :  { %s2187_s5 = smov 512   ;;  %s2188_s24 = smov 32  }
  0x35   :  { %29 = dma.hbm_to_vmem [thread:$0]  %s2387_s0, 1024, %s24_s26, [#allocation3], %s2187_s5, %s2187_s5, %s2188_s24  }
  0x36   :  { %s2189_s11 = smov [#allocation7]   ;;  %s2190_s13 = smov [#allocation10]  }
  0x37   :  { %s49_s12 = sshll.u32 %s2189_s11, 4  ;;  %s77_s1 = sshll.u32 %s2190_s13, 4  ;;  %s50_s12 = int_to_ptr.vmem [resolvable:$true] %s49_s12  ;;  %s78_s1 = int_to_ptr.vmem [resolvable:$true] %s77_s1 }
  0x38   :  { %s2106_s17 = scalar_lea.hbm %s2390_s3, 2048 }
  0x39   :  { %p2107_p10 = scmp.ne.s32.totalorder %s2390_s3, %s2106_s17  ;;  %p2110_p11 = scmp.lt.u32.totalorder %s2106_s17, %s2390_s3 }
  0x3b   :  { %p2112_p12 = pnand %p2110_p11, %p2107_p10 }
  0x3d   :  { %2115 = shalt.err (!%p2112_p12)
}
  0x3e   :  { %s2116_s0 = scalar_lea.vmem %s50_s12, 2048  ;;  %p2121_p0 = scmp.lt.s32.totalorder %s50_s12, %s50_s12 }
  0x3f   :  { %p2117_p13 = scmp.ne.s32.totalorder %s50_s12, %s2116_s0  ;;  %p2122_p1 = scmp.lt.s32.totalorder %s2116_s0, %s2116_s0 }
  0x41   :  { %p2123_p2 = por %p2122_p1, %p2121_p0 }
  0x43   :  { %p2124_p3 = pnand %p2123_p2, %p2117_p13 }
  0x45   :  { %2127 = shalt.err (!%p2124_p3)
}
  0x46   :  { %55 = dma.hbm_to_vmem [thread:$0]  %s2390_s3, 2048, %s50_s12, [#allocation6], %s2185_s10, %s2185_s10, %s2186_s14  }
  0x47   :  { %s2128_s5 = scalar_lea.hbm %s2394_s7, 1024 }
  0x48   :  { %p2129_p4 = scmp.ne.s32.totalorder %s2394_s7, %s2128_s5  ;;  %p2132_p5 = scmp.lt.u32.totalorder %s2128_s5, %s2394_s7 }
  0x4a   :  { %p2134_p6 = pnand %p2132_p5, %p2129_p4 }
  0x4c   :  { %2137 = shalt.err (!%p2134_p6)
}
  0x4d   :  { %s2138_s13 = scalar_lea.vmem %s78_s1, 1024  ;;  %p2143_p8 = scmp.lt.s32.totalorder %s78_s1, %s78_s1 }
  0x4e   :  { %p2139_p7 = scmp.ne.s32.totalorder %s78_s1, %s2138_s13  ;;  %p2144_p9 = scmp.lt.s32.totalorder %s2138_s13, %s2138_s13 }
  0x50   :  { %p2145_p10 = por %p2144_p9, %p2143_p8 }
  0x52   :  { %p2146_p11 = pnand %p2145_p10, %p2139_p7 }
  0x54   :  { %2149 = shalt.err (!%p2146_p11)
}
  0x55   :  { %83 = dma.hbm_to_vmem [thread:$0]  %s2394_s7, 1024, %s78_s1, [#allocation9], %s2185_s10, %s2185_s10, %s2186_s14  }
  0x56   :  { %2172 = dma.done.wait [#allocation3], 1024  }
  0x57   :  { %2173 = vsyncadd [#allocation3], 4294966272 }
  0x58   :  { %2174 = dma.done.wait [#allocation6], 18432  }
  0x59   :  { %2175 = vsyncadd [#allocation6], 4294948864 }
  0x5a   :  { %2176 = dma.done.wait [#allocation9], 2048  }
  0x5b   :  { %2177 = vsyncadd [#allocation9], 4294965248  ;;  %v1816_v0 = vld [vmem:[#allocation5 + $0x104] ss:$8 sps:$4 sm:$0xff]   ;;  %v1818_v1 = vld [vmem:[#allocation5 + $0x100] ss:$8 sps:$4 sm:$0xff]  }
  0x5c   :  { %973 = vmatprep.subr.bf16.mxu0 %v1816_v0  ;;  %v1819_v2 = vld [vmem:[#allocation5 + $0x114] ss:$8 sps:$4 sm:$0xff]   ;;  %v1821_v3 = vld [vmem:[#allocation5 + $0x110] ss:$8 sps:$4 sm:$0xff]   ;;  %v1822_v4 = vld [vmem:[#allocation5 + $0x124] ss:$8 sps:$4 sm:$0xff]  }
  0x5d   :  { %974 = vmatpush1.bf16.msra.mxu0 %v1818_v1  ;;  %v1824_v5 = vld [vmem:[#allocation5 + $0x120] ss:$8 sps:$4 sm:$0xff]   ;;  %v1825_v6 = vld [vmem:[#allocation5 + $0x134] ss:$8 sps:$4 sm:$0xff]   ;;  %v1827_v7 = vld [vmem:[#allocation5 + $0x130] ss:$8 sps:$4 sm:$0xff]  }
  0x5e   :  { %975 = vmatprep.subr.bf16.mxu0 %v1819_v2  ;;  %v1828_v8 = vld [vmem:[#allocation5 + $0x144] ss:$8 sps:$4 sm:$0xff]   ;;  %v1830_v9 = vld [vmem:[#allocation5 + $0x140] ss:$8 sps:$4 sm:$0xff]   ;;  %v1831_v10 = vld [vmem:[#allocation5 + $0x154] ss:$8 sps:$4 sm:$0xff]  }
  0x5f   :  { %v1833_v11 = vld [vmem:[#allocation5 + $0x150] ss:$8 sps:$4 sm:$0xff]   ;;  %v1834_v12 = vld [vmem:[#allocation5 + $0x164] ss:$8 sps:$4 sm:$0xff]   ;;  %v1836_v16 = vld [vmem:[#allocation5 + $0x160] ss:$8 sps:$4 sm:$0xff]  }
  0x60   :  { %v2316_v13 = vld [vmem:[#allocation2 + $0x8] sm:$0xff]  ;;  %v1837_v17 = vld [vmem:[#allocation5 + $0x174] ss:$8 sps:$4 sm:$0xff]   ;;  %v1839_v18 = vld [vmem:[#allocation5 + $0x170] ss:$8 sps:$4 sm:$0xff]   ;;  %vm2192_vm0 = vmmov 0  }
  0x61   :  { %976 = vmatpush1.bf16.msra.mxu0 %v1821_v3  ;;  %v2318_v14 = vld [vmem:[#allocation2 + $0x28] sm:$0xff]  ;;  %v1843_v21 = vld [vmem:[#allocation5 + $0x194] ss:$8 sps:$4 sm:$0xff]   ;;  %v1845_v22 = vld [vmem:[#allocation5 + $0x190] ss:$8 sps:$4 sm:$0xff]   ;;  %s2193_s17 = smov [#allocation11]  }
  0x62   :  { %977 = vmatprep.subr.bf16.mxu0 %v1822_v4  ;;  %v1538_v15 = vcombine.high %v2316_v13, %v2318_v14  ;;  %v1840_v19 = vld [vmem:[#allocation5 + $0x184] ss:$8 sps:$4 sm:$0xff]   ;;  %v1842_v20 = vld [vmem:[#allocation5 + $0x180] ss:$8 sps:$4 sm:$0xff]   ;;  %v1849_v25 = vld [vmem:[#allocation5 + $0x1b4] ss:$8 sps:$4 sm:$0xff]   ;;  %v1537_v50 = vcombine.low %v2316_v13, %v2318_v14 }
  0x63   :  { %v1846_v23 = vld [vmem:[#allocation5 + $0x1a4] ss:$8 sps:$4 sm:$0xff]   ;;  %v1848_v24 = vld [vmem:[#allocation5 + $0x1a0] ss:$8 sps:$4 sm:$0xff]   ;;  %v1851_v26 = vld [vmem:[#allocation5 + $0x1b0] ss:$8 sps:$4 sm:$0xff]  }
  0x64   :  { %1005 = vmatprep.mubr.bf16.mxu0 %v1538_v15  ;;  %v1909_v27 = vld [vmem:[#allocation5 + $0x4] ss:$8 sps:$4 sm:$0xff]   ;;  %v1911_v28 = vld [vmem:[#allocation5] ss:$8 sps:$4 sm:$0xff]   ;;  %v1915_v30 = vld [vmem:[#allocation5 + $0x14] ss:$8 sps:$4 sm:$0xff]  }
  0x65   :  { %978 = vmatpush1.bf16.msra.mxu0 %v1824_v5  ;;  %v1852_v29 = vld [vmem:[#allocation5 + $0x1c4] ss:$8 sps:$4 sm:$0xff]   ;;  %930 = vmatprep.subr.bf16.mxu1 %v1909_v27  ;;  %v1917_v31 = vld [vmem:[#allocation5 + $0x10] ss:$8 sps:$4 sm:$0xff]   ;;  %v1854_v32 = vld [vmem:[#allocation5 + $0x1c0] ss:$8 sps:$4 sm:$0xff]  }
  0x66   :  { %979 = vmatprep.subr.bf16.mxu0 %v1825_v6  ;;  %931 = vmatpush1.bf16.msra.mxu1 %v1911_v28  ;;  %v1855_v33 = vld [vmem:[#allocation5 + $0x1d4] ss:$8 sps:$4 sm:$0xff]   ;;  %v1921_v34 = vld [vmem:[#allocation5 + $0x24] ss:$8 sps:$4 sm:$0xff]   ;;  %v1923_v35 = vld [vmem:[#allocation5 + $0x20] ss:$8 sps:$4 sm:$0xff]  }
  0x67   :  { %932 = vmatprep.subr.bf16.mxu1 %v1915_v30  ;;  %v1857_v36 = vld [vmem:[#allocation5 + $0x1d0] ss:$8 sps:$4 sm:$0xff]   ;;  %v1927_v37 = vld [vmem:[#allocation5 + $0x34] ss:$8 sps:$4 sm:$0xff]   ;;  %v1858_v38 = vld [vmem:[#allocation5 + $0x1e4] ss:$8 sps:$4 sm:$0xff]  }
  0x68   :  { %v1929_v39 = vld [vmem:[#allocation5 + $0x30] ss:$8 sps:$4 sm:$0xff]   ;;  %v1933_v40 = vld [vmem:[#allocation5 + $0x44] ss:$8 sps:$4 sm:$0xff]   ;;  %v1860_v41 = vld [vmem:[#allocation5 + $0x1e0] ss:$8 sps:$4 sm:$0xff]  }
  0x69   :  { %980 = vmatpush1.bf16.msra.mxu0 %v1827_v7  ;;  %v1861_v42 = vld [vmem:[#allocation5 + $0x1f4] ss:$8 sps:$4 sm:$0xff]   ;;  %v1935_v43 = vld [vmem:[#allocation5 + $0x40] ss:$8 sps:$4 sm:$0xff]   ;;  %v1863_v44 = vld [vmem:[#allocation5 + $0x1f0] ss:$8 sps:$4 sm:$0xff]  }
  0x6a   :  { %981 = vmatprep.subr.bf16.mxu0 %v1828_v8  ;;  %933 = vmatpush1.bf16.msra.mxu1 %v1917_v31  ;;  %v1939_v45 = vld [vmem:[#allocation5 + $0x54] ss:$8 sps:$4 sm:$0xff]   ;;  %v1866_v46 = vld [vmem:[#allocation5 + $0x204] ss:$8 sps:$4 sm:$0xff]   ;;  %v1941_v49 = vld [vmem:[#allocation5 + $0x50] ss:$8 sps:$4 sm:$0xff]  }
  0x6b   :  { %934 = vmatprep.subr.bf16.mxu1 %v1921_v34  ;;  %v2322_v47 = vld [vmem:[#allocation2 + $0x10] sm:$0xff]  ;;  %v1945_v51 = vld [vmem:[#allocation5 + $0x64] ss:$8 sps:$4 sm:$0xff]   ;;  %v1864_v52 = vld [vmem:[#allocation5 + $0x200] ss:$8 sps:$4 sm:$0xff]   ;;  %s1521_s18 = sshll.u32 %s2193_s17, 4  ;;  %s1522_s18 = int_to_ptr.vmem [resolvable:$true] %s1521_s18 }
  0x6c   :  { %v2324_v48 = vld [vmem:[#allocation2 + $0x30] sm:$0xff]  ;;  %v1947_v55 = vld [vmem:[#allocation5 + $0x60] ss:$8 sps:$4 sm:$0xff]   ;;  %v1872_v58 = vld [vmem:[#allocation5 + $0x224] ss:$8 sps:$4 sm:$0xff]   ;;  %p2155_p13 = scmp.lt.s32.totalorder %s1522_s18, %s1522_s18 }
  0x6d   :  { %982 = vmatpush1.bf16.msra.mxu0 %v1830_v9  ;;  %v1540_v53 = vcombine.high %v2322_v47, %v2324_v48  ;;  %v1869_v54 = vld [vmem:[#allocation5 + $0x214] ss:$8 sps:$4 sm:$0xff]   ;;  %v1867_v57 = vld [vmem:[#allocation5 + $0x210] ss:$8 sps:$4 sm:$0xff]   ;;  %v1957_v60 = vld [vmem:[#allocation5 + $0x84] ss:$8 sps:$4 sm:$0xff]  }
  0x6e   :  { %983 = vmatprep.subr.bf16.mxu0 %v1831_v10  ;;  %935 = vmatpush1.bf16.msra.mxu1 %v1923_v35  ;;  %v1951_v56 = vld [vmem:[#allocation5 + $0x74] ss:$8 sps:$4 sm:$0xff]   ;;  %v1953_v59 = vld [vmem:[#allocation5 + $0x70] ss:$8 sps:$4 sm:$0xff]   ;;  %v1870_v61 = vld [vmem:[#allocation5 + $0x220] ss:$8 sps:$4 sm:$0xff]  }
  0x6f   :  { %936 = vmatprep.subr.bf16.mxu1 %v1927_v37  ;;  %v1875_v62 = vld [vmem:[#allocation5 + $0x234] ss:$8 sps:$4 sm:$0xff]   ;;  %v1959_v63 = vld [vmem:[#allocation5 + $0x80] ss:$8 sps:$4 sm:$0xff]   ;;  %v1873_v1 = vld [vmem:[#allocation5 + $0x230] ss:$8 sps:$4 sm:$0xff]  }
  0x70   :  { %v1963_v0 = vld [vmem:[#allocation5 + $0x94] ss:$8 sps:$4 sm:$0xff]   ;;  %v1878_v2 = vld [vmem:[#allocation5 + $0x244] ss:$8 sps:$4 sm:$0xff]   ;;  %v1965_v3 = vld [vmem:[#allocation5 + $0x90] ss:$8 sps:$4 sm:$0xff]  }
  0x71   :  { %984 = vmatpush1.bf16.msra.mxu0 %v1833_v11  ;;  %v1969_v4 = vld [vmem:[#allocation5 + $0xa4] ss:$8 sps:$4 sm:$0xff]   ;;  %v1876_v5 = vld [vmem:[#allocation5 + $0x240] ss:$8 sps:$4 sm:$0xff]   ;;  %v1881_v6 = vld [vmem:[#allocation5 + $0x254] ss:$8 sps:$4 sm:$0xff]  }
  0x72   :  { %985 = vmatprep.subr.bf16.mxu0 %v1834_v12  ;;  %937 = vmatpush1.bf16.msra.mxu1 %v1929_v39  ;;  %v1971_v7 = vld [vmem:[#allocation5 + $0xa0] ss:$8 sps:$4 sm:$0xff]   ;;  %v1975_v8 = vld [vmem:[#allocation5 + $0xb4] ss:$8 sps:$4 sm:$0xff]   ;;  %v1879_v9 = vld [vmem:[#allocation5 + $0x250] ss:$8 sps:$4 sm:$0xff]  }
  0x73   :  { %938 = vmatprep.subr.bf16.mxu1 %v1933_v40  ;;  %v1884_v10 = vld [vmem:[#allocation5 + $0x264] ss:$8 sps:$4 sm:$0xff]   ;;  %v1977_v11 = vld [vmem:[#allocation5 + $0xb0] ss:$8 sps:$4 sm:$0xff]   ;;  %v1999_v27 = vld [vmem:[#allocation5 + $0xf4] ss:$8 sps:$4 sm:$0xff]  }
  0x74   :  { %v102_v12 = vld [vmem:[#allocation2] sm:$0xff]  ;;  %v1891_v28 = vld [vmem:[#allocation5 + $0x290] ss:$8 sps:$4 sm:$0xff]   ;;  %v2011_v39 = vld [vmem:[#allocation7 + $0x8] sm:$0xff]  }
  0x75   :  { %986 = vmatpush1.bf16.msra.mxu0 %v1836_v16  ;;  %v106_v13 = vld [vmem:[#allocation2 + $0x20] sm:$0xff]  ;;  %v2001_v30 = vld [vmem:[#allocation5 + $0xf0] ss:$8 sps:$4 sm:$0xff]  }
  0x76   :  { %987 = vmatprep.subr.bf16.mxu0 %v1837_v17  ;;  %939 = vmatpush1.bf16.msra.mxu1 %v1935_v43  ;;  %v1981_v14 = vld [vmem:[#allocation5 + $0xc4] ss:$8 sps:$4 sm:$0xff]   ;;  %v1536_v15 = vcombine.high %v102_v12, %v106_v13  ;;  %v1882_v16 = vld [vmem:[#allocation5 + $0x260] ss:$8 sps:$4 sm:$0xff]   ;;  %v1887_v17 = vld [vmem:[#allocation5 + $0x274] ss:$8 sps:$4 sm:$0xff]   ;;  %v1535_v35 = vcombine.low %v102_v12, %v106_v13 }
  0x77   :  { %940 = vmatprep.subr.bf16.mxu1 %v1939_v45  ;;  %v2008_v31 = vld [vmem:[#allocation7 + $0x40] sm:$0xff]   ;;  %v1897_v37 = vld [vmem:[#allocation5 + $0x2b0] ss:$8 sps:$4 sm:$0xff]   ;;  %v1986_v13 = vld [vmem:[#allocation5 + $0x3b4] ss:$8 sps:$4 sm:$0xff]  }
  0x78   :  { %962 = vmatprep.mubr.bf16.mxu1 %v1536_v15  ;;  %v2009_v34 = vld [vmem:[#allocation7] sm:$0xff]   ;;  %v2012_v40 = vld [vmem:[#allocation7 + $0x50] sm:$0xff]  }
  0x79   :  { %988 = vmatpush1.bf16.msra.mxu0 %v1839_v18  ;;  %v1983_v18 = vld [vmem:[#allocation5 + $0xc0] ss:$8 sps:$4 sm:$0xff]   ;;  %v2013_v43 = vld [vmem:[#allocation7 + $0x10] sm:$0xff]   ;;  %v1992_v15 = vld [vmem:[#allocation5 + $0x3c4] ss:$8 sps:$4 sm:$0xff]  }
  0x7a   :  { %989 = vmatprep.subr.bf16.mxu0 %v1840_v19  ;;  %941 = vmatpush1.bf16.msra.mxu1 %v1941_v49  ;;  %v1987_v19 = vld [vmem:[#allocation5 + $0xd4] ss:$8 sps:$4 sm:$0xff]   ;;  %v1903_v45 = vld [vmem:[#allocation5 + $0x2d0] ss:$8 sps:$4 sm:$0xff]   ;;  %v1978_v12 = vld [vmem:[#allocation5 + $0x3a0] ss:$8 sps:$4 sm:$0xff]  }
  0x7b   :  { %942 = vmatprep.subr.bf16.mxu1 %v1945_v51  ;;  %v2015_v49 = vld [vmem:[#allocation7 + $0x18] sm:$0xff]  }
  0x7c   :  { %v1914_v51 = vld [vmem:[#allocation5 + $0x2f4] ss:$8 sps:$4 sm:$0xff]  }
  0x7d   :  { %990 = vmatpush1.bf16.msra.mxu0 %v1842_v20  ;;  %v1885_v20 = vld [vmem:[#allocation5 + $0x270] ss:$8 sps:$4 sm:$0xff]  }
  0x7e   :  { %991 = vmatprep.subr.bf16.mxu0 %v1843_v21  ;;  %943 = vmatpush1.bf16.msra.mxu1 %v1947_v55  ;;  %v1890_v21 = vld [vmem:[#allocation5 + $0x284] ss:$8 sps:$4 sm:$0xff]   ;;  %v2332_v55 = vld [vmem:[#allocation2 + $0x38] sm:$0xff] }
  0x7f   :  { %944 = vmatprep.subr.bf16.mxu1 %v1951_v56  ;;  %v1539_v56 = vcombine.low %v2322_v47, %v2324_v48  ;;  %v1944_v47 = vld [vmem:[#allocation5 + $0x344] ss:$8 sps:$4 sm:$0xff]   ;;  %v1942_v48 = vld [vmem:[#allocation5 + $0x340] ss:$8 sps:$4 sm:$0xff]  }
  0x81   :  { %992 = vmatpush1.bf16.msra.mxu0 %v1845_v22  ;;  %v1888_v22 = vld [vmem:[#allocation5 + $0x280] ss:$8 sps:$4 sm:$0xff]  }
  0x82   :  { %993 = vmatprep.subr.bf16.mxu0 %v1846_v23  ;;  %945 = vmatpush1.bf16.msra.mxu1 %v1953_v59  ;;  %v1989_v23 = vld [vmem:[#allocation5 + $0xd0] ss:$8 sps:$4 sm:$0xff]   ;;  %v1926_v59 = vld [vmem:[#allocation5 + $0x314] ss:$8 sps:$4 sm:$0xff]  }
  0x83   :  { %946 = vmatprep.subr.bf16.mxu1 %v1957_v60  ;;  %v1924_v60 = vld [vmem:[#allocation5 + $0x310] ss:$8 sps:$4 sm:$0xff]  }
  0x85   :  { %994 = vmatpush1.bf16.msra.mxu0 %v1848_v24  ;;  %v1893_v24 = vld [vmem:[#allocation5 + $0x294] ss:$8 sps:$4 sm:$0xff]  }
  0x86   :  { %995 = vmatprep.subr.bf16.mxu0 %v1849_v25  ;;  %947 = vmatpush1.bf16.msra.mxu1 %v1959_v63  ;;  %v1993_v25 = vld [vmem:[#allocation5 + $0xe4] ss:$8 sps:$4 sm:$0xff]   ;;  %v1938_v63 = vld [vmem:[#allocation5 + $0x334] ss:$8 sps:$4 sm:$0xff]  }
  0x87   :  { %948 = vmatprep.subr.bf16.mxu1 %v1963_v0  ;;  %v1936_v0 = vld [vmem:[#allocation5 + $0x330] ss:$8 sps:$4 sm:$0xff]  }
  0x89   :  { %996 = vmatpush1.bf16.msra.mxu0 %v1851_v26  ;;  %v1995_v26 = vld [vmem:[#allocation5 + $0xe0] ss:$8 sps:$4 sm:$0xff]  }
  0x8a   :  { %997 = vmatprep.subr.bf16.mxu0 %v1852_v29  ;;  %949 = vmatpush1.bf16.msra.mxu1 %v1965_v3  ;;  %v1896_v29 = vld [vmem:[#allocation5 + $0x2a4] ss:$8 sps:$4 sm:$0xff]  }
  0x8b   :  { %950 = vmatprep.subr.bf16.mxu1 %v1969_v4  ;;  %v1956_v3 = vld [vmem:[#allocation5 + $0x364] ss:$8 sps:$4 sm:$0xff]   ;;  %v1954_v4 = vld [vmem:[#allocation5 + $0x360] ss:$8 sps:$4 sm:$0xff]  }
  0x8d   :  { %998 = vmatpush1.bf16.msra.mxu0 %v1854_v32  ;;  %v1894_v32 = vld [vmem:[#allocation5 + $0x2a0] ss:$8 sps:$4 sm:$0xff]  }
  0x8e   :  { %999 = vmatprep.subr.bf16.mxu0 %v1855_v33  ;;  %951 = vmatpush1.bf16.msra.mxu1 %v1971_v7  ;;  %v1899_v33 = vld [vmem:[#allocation5 + $0x2b4] ss:$8 sps:$4 sm:$0xff]   ;;  %v1968_v7 = vld [vmem:[#allocation5 + $0x384] ss:$8 sps:$4 sm:$0xff]  }
  0x8f   :  { %952 = vmatprep.subr.bf16.mxu1 %v1975_v8  ;;  %v1966_v8 = vld [vmem:[#allocation5 + $0x380] ss:$8 sps:$4 sm:$0xff]  }
  0x91   :  { %1000 = vmatpush1.bf16.msra.mxu0 %v1857_v36  ;;  %v2010_v36 = vld [vmem:[#allocation7 + $0x48] sm:$0xff]  }
  0x92   :  { %1001 = vmatprep.subr.bf16.mxu0 %v1858_v38  ;;  %953 = vmatpush1.bf16.msra.mxu1 %v1977_v11  ;;  %v1902_v38 = vld [vmem:[#allocation5 + $0x2c4] ss:$8 sps:$4 sm:$0xff]  }
  0x93   :  { %954 = vmatprep.subr.bf16.mxu1 %v1981_v14  ;;  %v1980_v11 = vld [vmem:[#allocation5 + $0x3a4] ss:$8 sps:$4 sm:$0xff]   ;;  %v1984_v14 = vld [vmem:[#allocation5 + $0x3b0] ss:$8 sps:$4 sm:$0xff]  }
  0x95   :  { %1002 = vmatpush1.bf16.msra.mxu0 %v1860_v41  ;;  %v1900_v41 = vld [vmem:[#allocation5 + $0x2c0] ss:$8 sps:$4 sm:$0xff]  }
  0x96   :  { %1003 = vmatprep.subr.bf16.mxu0 %v1861_v42  ;;  %955 = vmatpush1.bf16.msra.mxu1 %v1983_v18  ;;  %v1905_v42 = vld [vmem:[#allocation5 + $0x2d4] ss:$8 sps:$4 sm:$0xff]   ;;  %v1996_v18 = vld [vmem:[#allocation5 + $0x3d0] ss:$8 sps:$4 sm:$0xff]  }
  0x97   :  { %956 = vmatprep.subr.bf16.mxu1 %v1987_v19  ;;  %v2004_v19 = vld [vmem:[#allocation5 + $0x3e4] ss:$8 sps:$4 sm:$0xff]  }
  0x99   :  { %1004 = vmatpush1.bf16.msra.mxu0 %v1863_v44  ;;  %v2014_v44 = vld [vmem:[#allocation7 + $0x58] sm:$0xff]  }
  0x9a   :  { %1016 = vmatprep.subr.bf16.mxu0 %v1866_v46  ;;  %957 = vmatpush1.bf16.msra.mxu1 %v1989_v23  ;;  %v1908_v46 = vld [vmem:[#allocation5 + $0x2e4] ss:$8 sps:$4 sm:$0xff]  }
  0x9b   :  { %958 = vmatprep.subr.bf16.mxu1 %v1993_v25  ;;  %v2017_v25 = vld [vmem:[#allocation7 + $0x20] sm:$0xff]  }
  0x9c   :  { %1006 = vmatmul.mubr.bf16.vlgmr.msra.gmra.mrb[0].mxu0 %v1537_v50  ;;  %v1906_v50 = vld [vmem:[#allocation5 + $0x2e0] ss:$8 sps:$4 sm:$0xff]  }
  0x9d   :  { %1017 = vmatpush1.bf16.msra.mxu0 %v1864_v52  ;;  %1048 = vmatprep.mubr.bf16.mxu0 %v1540_v53  ;;  %v1912_v52 = vld [vmem:[#allocation5 + $0x2f0] ss:$8 sps:$4 sm:$0xff]   ;;  %v1920_v53 = vld [vmem:[#allocation5 + $0x304] ss:$8 sps:$4 sm:$0xff]  }
  0x9e   :  { %1018 = vmatprep.subr.bf16.mxu0 %v1869_v54  ;;  %959 = vmatpush1.bf16.msra.mxu1 %v1995_v26  ;;  %v2330_v54 = vld [vmem:[#allocation2 + $0x18] sm:$0xff]  ;;  %v2018_v26 = vld [vmem:[#allocation7 + $0x68] sm:$0xff]  }
  0x9f   :  { %960 = vmatprep.subr.bf16.mxu1 %v1999_v27  ;;  %v1541_v23 = vcombine.low %v2330_v54, %v2332_v55  ;;  %v2019_v27 = vld [vmem:[#allocation7 + $0x28] sm:$0xff]  }
  0xa1   :  { %1019 = vmatpush1.bf16.msra.mxu0 %v1867_v57  ;;  %v1918_v57 = vld [vmem:[#allocation5 + $0x300] ss:$8 sps:$4 sm:$0xff]  }
  0xa2   :  { %1020 = vmatprep.subr.bf16.mxu0 %v1872_v58  ;;  %961 = vmatpush1.bf16.msra.mxu1 %v2001_v30  ;;  %v1542_v58 = vcombine.high %v2330_v54, %v2332_v55  ;;  %v2022_v30 = vld [vmem:[#allocation7 + $0x78] sm:$0xff]  }
  0xa3   :  { %1706 = vmatprep.subr.bf16.mxu1 %v2008_v31  ;;  %v2023_v31 = vld [vmem:[#allocation7 + $0x38] sm:$0xff]  }
  0xa5   :  { %1021 = vmatpush1.bf16.msra.mxu0 %v1870_v61  ;;  %963 = vmatmul.mubr.bf16.vlgmr.msra.gmra.mrb[0].mxu1 %v1535_v35  ;;  %v1932_v61 = vld [vmem:[#allocation5 + $0x324] ss:$8 sps:$4 sm:$0xff]  }
  0xa6   :  { %1022 = vmatprep.subr.bf16.mxu0 %v1875_v62  ;;  %1707 = vmatpush3.bf16.msra.mxu1 %v2009_v34  ;;  %v1930_v62 = vld [vmem:[#allocation5 + $0x320] ss:$8 sps:$4 sm:$0xff]  }
  0xa7   :  { %1708 = vmatprep.subr.bf16.mxu1 %v2010_v36 }
  0xa9   :  { %1023 = vmatpush1.bf16.msra.mxu0 %v1873_v1  ;;  %v1950_v1 = vld [vmem:[#allocation5 + $0x354] ss:$8 sps:$4 sm:$0xff]  }
  0xaa   :  { %1024 = vmatprep.subr.bf16.mxu0 %v1878_v2  ;;  %1709 = vmatpush3.bf16.msra.mxu1 %v2011_v39  ;;  %v1948_v2 = vld [vmem:[#allocation5 + $0x350] ss:$8 sps:$4 sm:$0xff]  }
  0xab   :  { %1710 = vmatprep.subr.bf16.mxu1 %v2012_v40  ;;  %v238_v40 = vld [vmem:[%s2389_s2] sm:$0x3] }
  0xad   :  { %1025 = vmatpush1.bf16.msra.mxu0 %v1876_v5  ;;  %v1962_v5 = vld [vmem:[#allocation5 + $0x374] ss:$8 sps:$4 sm:$0xff]  }
  0xae   :  { %1026 = vmatprep.subr.bf16.mxu0 %v1881_v6  ;;  %1711 = vmatpush3.bf16.msra.mxu1 %v2013_v43  ;;  %v1960_v6 = vld [vmem:[#allocation5 + $0x370] ss:$8 sps:$4 sm:$0xff]  }
  0xaf   :  { %1712 = vmatprep.subr.bf16.mxu1 %v2014_v44 }
  0xb1   :  { %1027 = vmatpush1.bf16.msra.mxu0 %v1879_v9  ;;  %v1974_v9 = vld [vmem:[#allocation5 + $0x394] ss:$8 sps:$4 sm:$0xff]  }
  0xb2   :  { %1028 = vmatprep.subr.bf16.mxu0 %v1884_v10  ;;  %1713 = vmatpush3.bf16.msra.mxu1 %v2015_v49  ;;  %v1972_v10 = vld [vmem:[#allocation5 + $0x390] ss:$8 sps:$4 sm:$0xff]  }
  0xb5   :  { %1029 = vmatpush1.bf16.msra.mxu0 %v1882_v16  ;;  %v1990_v16 = vld [vmem:[#allocation5 + $0x3c0] ss:$8 sps:$4 sm:$0xff]  }
  0xb6   :  { %1030 = vmatprep.subr.bf16.mxu0 %v1887_v17  ;;  %v1998_v17 = vld [vmem:[#allocation5 + $0x3d4] ss:$8 sps:$4 sm:$0xff]  }
  0xb9   :  { %1031 = vmatpush1.bf16.msra.mxu0 %v1885_v20  ;;  %v2002_v20 = vld [vmem:[#allocation5 + $0x3e0] ss:$8 sps:$4 sm:$0xff]  }
  0xba   :  { %1032 = vmatprep.subr.bf16.mxu0 %v1890_v21  ;;  %v2007_v21 = vld [vmem:[#allocation5 + $0x3f4] ss:$8 sps:$4 sm:$0xff]  }
  0xbd   :  { %1033 = vmatpush1.bf16.msra.mxu0 %v1888_v22  ;;  %v2005_v22 = vld [vmem:[#allocation5 + $0x3f0] ss:$8 sps:$4 sm:$0xff]  }
  0xbe   :  { %1034 = vmatprep.subr.bf16.mxu0 %v1893_v24  ;;  %v2016_v24 = vld [vmem:[#allocation7 + $0x60] sm:$0xff]  }
  0xbf   :  { %1714 = vmatprep.subr.bf16.mxu1 %v2016_v24  ;;  %v2038_v24 = vld [vmem:[#allocation10 + $0x30] sm:$0xff]  }
  0xc0   :  { %1715 = vmatpush3.bf16.msra.mxu1 %v2017_v25  ;;  %v2039_v25 = vld [vmem:[#allocation10 + $0x38] sm:$0xff]  }
  0xc1   :  { %1035 = vmatpush1.bf16.msra.mxu0 %v1891_v28  ;;  %1716 = vmatprep.subr.bf16.mxu1 %v2018_v26  ;;  %v2020_v28 = vld [vmem:[#allocation7 + $0x70] sm:$0xff]   ;;  %v1688_v26 = vld [vmem:[%s2393_s6] ss:$0 sm:$0xff]  ;;  %s2150_s6 = scalar_lea.vmem %s1522_s18, 256 }
  0xc2   :  { %1036 = vmatprep.subr.bf16.mxu0 %v1896_v29  ;;  %v2021_v29 = vld [vmem:[#allocation7 + $0x30] sm:$0xff]   ;;  %p2151_p12 = scmp.ne.s32.totalorder %s1522_s18, %s2150_s6  ;;  %p2156_p0 = scmp.lt.s32.totalorder %s2150_s6, %s2150_s6 }
  0xc4   :  { %1717 = vmatpush3.bf16.msra.mxu1 %v2019_v27  ;;  %p2157_p1 = por %p2156_p0, %p2155_p13 }
  0xc5   :  { %1037 = vmatpush1.bf16.msra.mxu0 %v1894_v32  ;;  %1718 = vmatprep.subr.bf16.mxu1 %v2020_v28  ;;  %v2191_v32 = vmov 0.0  }
  0xc6   :  { %1038 = vmatprep.subr.bf16.mxu0 %v1899_v33  ;;  %p2158_p2 = pnand %p2157_p1, %p2151_p12 }
  0xc8   :  { %1719 = vmatpush3.bf16.msra.mxu1 %v2021_v29 }
  0xc9   :  { %1039 = vmatpush1.bf16.msra.mxu0 %v1897_v37  ;;  %1720 = vmatprep.subr.bf16.mxu1 %v2022_v30  ;;  %v240_v37 = vlaneseq }
  0xca   :  { %1040 = vmatprep.subr.bf16.mxu0 %v1902_v38 }
  0xcb   :  { %v241_v38 = vshrl.u32 %v240_v37, 7 }
  0xcc   :  { %1721 = vmatpush3.bf16.msra.mxu1 %v2023_v31 }
  0xcd   :  { %1041 = vmatpush1.bf16.msra.mxu0 %v1900_v41  ;;  %1746 = vmatprep.subr.bf16.mxu1 %v2191_v32  ;;  %v242_v39 = vsub.s32 0, %v241_v38  ;;  %v246_v41 = vsub.s32 1, %v241_v38 }
  0xce   :  { %1042 = vmatprep.subr.bf16.mxu0 %v1905_v42 }
  0xcf   :  { %v243_v42 = vrot.slane %v238_v40, %v242_v39  ;;  %v247_v43 = vrot.slane %v238_v40, %v246_v41 }
  0xd1   :  { %1043 = vmatpush1.bf16.msra.mxu0 %v1903_v45 }
  0xd2   :  { %1044 = vmatprep.subr.bf16.mxu0 %v1908_v46 }
  0xd5   :  { %1045 = vmatpush1.bf16.msra.mxu0 %v1906_v50 }
  0xd6   :  { %1046 = vmatprep.subr.bf16.mxu0 %v1914_v51 }
  0xd9   :  { %1047 = vmatpush1.bf16.msra.mxu0 %v1912_v52 }
  0xda   :  { %1059 = vmatprep.subr.bf16.mxu0 %v1920_v53 }
  0xdc   :  { %1049 = vmatmul.mubr.bf16.vlgmr.msra.gmra.mrb[0].mxu0 %v1539_v56 }
  0xdd   :  { %1060 = vmatpush1.bf16.msra.mxu0 %v1918_v57  ;;  %1091 = vmatprep.mubr.bf16.mxu0 %v1542_v58 }
  0xde   :  { %1061 = vmatprep.subr.bf16.mxu0 %v1926_v59 }
  0xe1   :  { %1062 = vmatpush1.bf16.msra.mxu0 %v1924_v60 }
  0xe2   :  { %1063 = vmatprep.subr.bf16.mxu0 %v1932_v61 }
  0xe5   :  { %1064 = vmatpush1.bf16.msra.mxu0 %v1930_v62 }
  0xe6   :  { %1065 = vmatprep.subr.bf16.mxu0 %v1938_v63 }
  0xe9   :  { %1066 = vmatpush1.bf16.msra.mxu0 %v1936_v0  ;;  %v2024_v0 = vld [vmem:[#allocation8] sm:$0xff]  }
  0xea   :  { %1067 = vmatprep.subr.bf16.mxu0 %v1944_v47  ;;  %v2025_v47 = vld [vmem:[#allocation8 + $0x8] sm:$0xff]  }
  0xed   :  { %1068 = vmatpush1.bf16.msra.mxu0 %v1942_v48  ;;  %v2026_v48 = vld [vmem:[#allocation8 + $0x10] sm:$0xff]  }
  0xee   :  { %1069 = vmatprep.subr.bf16.mxu0 %v1950_v1  ;;  %v2027_v1 = vld [vmem:[#allocation8 + $0x18] sm:$0xff]  }
  0xf1   :  { %1070 = vmatpush1.bf16.msra.mxu0 %v1948_v2  ;;  %v2028_v2 = vld [vmem:[#allocation8 + $0x20] sm:$0xff]  }
  0xf2   :  { %1071 = vmatprep.subr.bf16.mxu0 %v1956_v3  ;;  %v2029_v3 = vld [vmem:[#allocation8 + $0x28] sm:$0xff]  }
  0xf5   :  { %1072 = vmatpush1.bf16.msra.mxu0 %v1954_v4  ;;  %v2030_v4 = vld [vmem:[#allocation8 + $0x30] sm:$0xff]  }
  0xf6   :  { %1073 = vmatprep.subr.bf16.mxu0 %v1962_v5  ;;  %v2031_v5 = vld [vmem:[#allocation8 + $0x38] sm:$0xff]  }
  0xf9   :  { %1074 = vmatpush1.bf16.msra.mxu0 %v1960_v6 }
  0xfa   :  { %1075 = vmatprep.subr.bf16.mxu0 %v1968_v7  ;;  %v1671_v7 = vld [vmem:[%s2391_s4] ss:$0 sm:$0xff] }
  0xfd   :  { %1076 = vmatpush1.bf16.msra.mxu0 %v1966_v8 }
  0xfe   :  { %1077 = vmatprep.subr.bf16.mxu0 %v1974_v9 }
 0x101   :  { %1078 = vmatpush1.bf16.msra.mxu0 %v1972_v10 }
 0x102   :  { %1079 = vmatprep.subr.bf16.mxu0 %v1980_v11 }
 0x105   :  { %1080 = vmatpush1.bf16.msra.mxu0 %v1978_v12 }
 0x106   :  { %1081 = vmatprep.subr.bf16.mxu0 %v1986_v13 }
 0x109   :  { %1082 = vmatpush1.bf16.msra.mxu0 %v1984_v14 }
 0x10a   :  { %1083 = vmatprep.subr.bf16.mxu0 %v1992_v15 }
 0x10d   :  { %1084 = vmatpush1.bf16.msra.mxu0 %v1990_v16 }
 0x10e   :  { %1085 = vmatprep.subr.bf16.mxu0 %v1998_v17  ;;  %v2032_v17 = vld [vmem:[#allocation10] sm:$0xff]  }
 0x111   :  { %1086 = vmatpush1.bf16.msra.mxu0 %v1996_v18 }
 0x112   :  { %1087 = vmatprep.subr.bf16.mxu0 %v2004_v19  ;;  %v2033_v19 = vld [vmem:[#allocation10 + $0x8] sm:$0xff]  }
 0x115   :  { %1088 = vmatpush1.bf16.msra.mxu0 %v2002_v20  ;;  %v2034_v20 = vld [vmem:[#allocation10 + $0x10] sm:$0xff]  }
 0x116   :  { %1089 = vmatprep.subr.bf16.mxu0 %v2007_v21  ;;  %v2035_v21 = vld [vmem:[#allocation10 + $0x18] sm:$0xff]  }
 0x119   :  { %1090 = vmatpush1.bf16.msra.mxu0 %v2005_v22  ;;  %v2036_v22 = vld [vmem:[#allocation10 + $0x20] sm:$0xff]  }
 0x11c   :  { %1092 = vmatmul.mubr.bf16.vlgmr.msra.gmra.mrb[0].mxu0 %v1541_v23  ;;  %v2037_v23 = vld [vmem:[#allocation10 + $0x28] sm:$0xff]  }
 0x178   :  { %v964_v33 = vpop.f32.mrb[0].mxu1 }
 0x179   :  { %v966_v34 = vpop.f32.mrb[1].mxu1  ;;  %v965_v44 = vadd.f32 %v964_v33, %v243_v42 }
 0x17a   :  { %v968_v35 = vpop.f32.mrb[2].mxu1  ;;  %v967_v45 = vadd.f32 %v966_v34, %v247_v43 }
 0x17b   :  { %v970_v36 = vpop.f32.mrb[3].mxu1  ;;  %v969_v49 = vadd.f32 %v968_v35, %v243_v42 }
 0x17c   :  { %v971_v52 = vadd.f32 %v970_v36, %v247_v43 }
 0x1ef   :  { %v1093_v46 = vpop.f32.mrb[0].mxu0 }
 0x1f0   :  { %v1787_v50 = vadd.f32 %v1093_v46, %v965_v44  ;;  %v1095_v51 = vpop.f32.mrb[1].mxu0 }
 0x1f1   :  { %v1789_v53 = vadd.f32 %v1095_v51, %v967_v45  ;;  %v1097_v54 = vpop.f32.mrb[2].mxu0 }
 0x1f2   :  { %v1791_v55 = vadd.f32 %v1097_v54, %v969_v49  ;;  %v1099_v56 = vpop.f32.mrb[3].mxu0  ;;  %v1102_v58 = vmax.f32 %v1787_v50, 0.0 }
 0x1f3   :  { %v1793_v57 = vadd.f32 %v1099_v56, %v971_v52  ;;  %v1103_v60 = vmax.f32 %v1789_v53, 0.0 }
 0x1f4   :  { %v1104_v59 = vmax.f32 %v1791_v55, 0.0 }
 0x1f5   :  { %v1105_v61 = vmax.f32 %v1793_v57, 0.0 }
 0x1f6   :  { %v1106_v62 = vpack.c.bf16 %v1104_v59, %v1102_v58 }
 0x1f7   :  { %v1107_v63 = vpack.c.bf16 %v1105_v61, %v1103_v60 }
 0x1f9   :  { %1275 = vmatprep.mubr.bf16.mxu1 %v1107_v63 }
 0x1fa   :  { %1276 = vmatmul.mubr.bf16.vlgmr.msra.gmra.mrb[4].mxu1 %v1106_v62 }
 0x1fb   :  { %1747 = vmatpush3.bf16.msra.mxu1 %v2024_v0  ;;  %1762 = vmatprep.mubr.msk.bf16.mxu1 %vm2192_vm0, %v2191_v32 }
 0x1fc   :  { %1748 = vmatprep.subr.bf16.mxu1 %v2191_v32 }
 0x1ff   :  { %1749 = vmatpush3.bf16.msra.mxu1 %v2025_v47 }
 0x200   :  { %1750 = vmatprep.subr.bf16.mxu1 %v2191_v32 }
 0x203   :  { %1751 = vmatpush3.bf16.msra.mxu1 %v2026_v48 }
 0x204   :  { %1752 = vmatprep.subr.bf16.mxu1 %v2191_v32 }
 0x207   :  { %1753 = vmatpush3.bf16.msra.mxu1 %v2027_v1 }
 0x208   :  { %1754 = vmatprep.subr.bf16.mxu1 %v2191_v32 }
 0x20b   :  { %1755 = vmatpush3.bf16.msra.mxu1 %v2028_v2 }
 0x20c   :  { %1756 = vmatprep.subr.bf16.mxu1 %v2191_v32 }
 0x20f   :  { %1757 = vmatpush3.bf16.msra.mxu1 %v2029_v3 }
 0x210   :  { %1758 = vmatprep.subr.bf16.mxu1 %v2191_v32 }
 0x213   :  { %1759 = vmatpush3.bf16.msra.mxu1 %v2030_v4 }
 0x214   :  { %1760 = vmatprep.subr.bf16.mxu1 %v2191_v32 }
 0x217   :  { %1761 = vmatpush3.bf16.msra.mxu1 %v2031_v5 }
 0x218   :  { %1766 = vmatprep.subr.bf16.mxu1 %v2191_v32 }
 0x2cd   :  { %v1722_v6 = vpop.f32.mrb[4].mxu1 }
 0x2ce   :  { %v1723_v8 = vpop.f32.mrb[5].mxu1 }
 0x2cf   :  { %v1724_v9 = vadd.f32 %v1723_v8, %v1722_v6  ;;  %v1725_v10 = vpop.f32.mrb[6].mxu1 }
 0x2d0   :  { %v1726_v11 = vpop.f32.mrb[7].mxu1 }
 0x2d1   :  { %v1278_v12 = vadd.f32 %v1724_v9, %v1671_v7  ;;  %v1727_v13 = vadd.f32 %v1726_v11, %v1725_v10 }
 0x2d3   :  { %v1281_v14 = vadd.f32 %v1727_v13, %v1671_v7  ;;  %v1284_v15 = vmax.f32 %v1278_v12, 0.0 }
 0x2d5   :  { %v1285_v16 = vmax.f32 %v1281_v14, 0.0 }
 0x2d7   :  { %v1286_v18 = vpack.c.bf16 %v1285_v16, %v1284_v15 }
 0x2d9   :  { %1763 = vmatmul.mubr.bf16.vlgmr.msra.gmra.mrb[8].mxu1 %v1286_v18 }
 0x2da   :  { %1767 = vmatpush3.bf16.msra.mxu1 %v2032_v17  ;;  %1782 = vmatprep.mubr.msk.bf16.mxu1 %vm2192_vm0, %v2191_v32 }
 0x2db   :  { %1768 = vmatprep.subr.bf16.mxu1 %v2191_v32 }
 0x2de   :  { %1769 = vmatpush3.bf16.msra.mxu1 %v2033_v19 }
 0x2df   :  { %1770 = vmatprep.subr.bf16.mxu1 %v2191_v32 }
 0x2e2   :  { %1771 = vmatpush3.bf16.msra.mxu1 %v2034_v20 }
 0x2e3   :  { %1772 = vmatprep.subr.bf16.mxu1 %v2191_v32 }
 0x2e6   :  { %1773 = vmatpush3.bf16.msra.mxu1 %v2035_v21 }
 0x2e7   :  { %1774 = vmatprep.subr.bf16.mxu1 %v2191_v32 }
 0x2ea   :  { %1775 = vmatpush3.bf16.msra.mxu1 %v2036_v22 }
 0x2eb   :  { %1776 = vmatprep.subr.bf16.mxu1 %v2191_v32 }
 0x2ee   :  { %1777 = vmatpush3.bf16.msra.mxu1 %v2037_v23 }
 0x2ef   :  { %1778 = vmatprep.subr.bf16.mxu1 %v2191_v32 }
 0x2f2   :  { %1779 = vmatpush3.bf16.msra.mxu1 %v2038_v24 }
 0x2f3   :  { %1780 = vmatprep.subr.bf16.mxu1 %v2191_v32  ;;  %v1697_v32 = vld [vmem:[%s2395_s8] ss:$0 sm:$0xff] }
 0x2f6   :  { %1781 = vmatpush3.bf16.msra.mxu1 %v2039_v25 }
 0x3ac   :  { %v1392_v27 = vpop.f32.mrb[8].mxu1 }
 0x3ad   :  { %v1393_v28 = vadd.f32 %v1688_v26, %v1392_v27  ;;  %v1764_v29 = vpop.f32.mrb[9].mxu1 }
 0x3ae   :  { %v1395_v30 = vpop.f32.mrb[10].mxu1 }
 0x3af   :  { %v1396_v31 = vadd.f32 %v1688_v26, %v1395_v30  ;;  %v1765_v33 = vpop.f32.mrb[11].mxu1  ;;  %v1399_v34 = vmax.f32 %v1393_v28, 0.0 }
 0x3b1   :  { %v1400_v35 = vmax.f32 %v1396_v31, 0.0 }
 0x3b3   :  { %v1401_v36 = vpack.c.bf16 %v1400_v35, %v1399_v34 }
 0x3b5   :  { %1783 = vmatmul.mubr.bf16.vlgmr.msra.gmra.mrb[12].mxu1 %v1401_v36 }
 0x488   :  { %v1507_v37 = vpop.f32.mrb[12].mxu1 }
 0x489   :  { %v1508_v38 = vadd.f32 %v1697_v32, %v1507_v37  ;;  %v1784_v39 = vpop.f32.mrb[13].mxu1 }
 0x48a   :  { %v1510_v40 = vpop.f32.mrb[14].mxu1 }
 0x48b   :  { %1514 = vst [vmem:[#allocation11] sm:$0xff] %v1508_v38  ;;  %v1511_v41 = vadd.f32 %v1697_v32, %v1510_v40  ;;  %v1785_v42 = vpop.f32.mrb[15].mxu1 }
 0x48d   :  { %1515 = vst [vmem:[#allocation11 + $0x8] sm:$0xff] %v1511_v41 }
 0x48e   :  { %2161 = shalt.err (!%p2158_p2)
}
 0x48f   :  { %s2162_s22 = scalar_lea.hbm %s2396_s9, 256 }
 0x490   :  { %p2163_p3 = scmp.ne.s32.totalorder %s2396_s9, %s2162_s22  ;;  %p2166_p4 = scmp.lt.u32.totalorder %s2162_s22, %s2396_s9 }
 0x492   :  { %p2168_p5 = pnand %p2166_p4, %p2163_p3 }
 0x494   :  { %2171 = shalt.err (!%p2168_p5)
}
 0x495   :  { %1527 = dma.vmem_to_hbm [thread:$0]  %s1522_s18, 256, %s2396_s9, [#allocation4], %s2181_s19, %s2181_s19, %s2182_s20  }
 0x496   :  { %2178 = dma.done.wait [#allocation4], 256  }
 0x497   :  { %2179 = vsyncadd [#allocation4], 4294967040 }
 0x498   :  { %1531 = vsyncpa [#allocation3], 1 }
 0x499   :  { %1532 = vsyncpa [#allocation6], 1 }
 0x49a   :  { %1533 = vsyncpa [#allocation9], 1 }
 0x49b   :  { %1534 = vsyncpa [#allocation4], 1 }

</bundles_post_ra>
